<compile_context>
chip_gen: v5e
topology: v5e:2x2
jax: 0.10.0
libtpu: 0.0.40
codegen_flags: <defaults>
</compile_context>

<pallas_src>
import math

import jax
import jax.numpy as jnp
from jax.experimental import pallas as pl
from jax.experimental.pallas import tpu as pltpu


def cbf_kernel(state_ref, obs_ref,
               w0_ref, b0_ref, w1_ref, b1_ref, w2_ref, b2_ref,
               w3_ref, b3_ref, w4r_ref, b4_ref, out_ref):
    tile_b = state_ref.shape[0]
    tile_rows = obs_ref.shape[0]
    k_obstacle = tile_rows // tile_b

    # Broadcast each state row to its k_obstacle consecutive rows via a 0/1 selection
    # matmul (avoids in-kernel gathers / layout-changing reshapes; exact arithmetic).
    r = jax.lax.broadcasted_iota(jnp.int32, (tile_rows, tile_b), 0)
    c = jax.lax.broadcasted_iota(jnp.int32, (tile_rows, tile_b), 1)
    sel = jnp.logical_and(r >= c * k_obstacle, r < (c + 1) * k_obstacle)
    s_rows = jnp.dot(sel.astype(jnp.float32), state_ref[...],
                     preferred_element_type=jnp.float32)            # (tile_rows, n_state)

    x = s_rows - obs_ref[...]                                       # state - obstacle

    h = jnp.dot(x, w0_ref[...], preferred_element_type=jnp.float32) + b0_ref[...]
    h = jnp.maximum(h, 0.0)
    h = jnp.dot(h, w1_ref[...], preferred_element_type=jnp.float32) + b1_ref[...]
    h = jnp.maximum(h, 0.0)
    h = jnp.dot(h, w2_ref[...], preferred_element_type=jnp.float32) + b2_ref[...]
    h = jnp.maximum(h, 0.0)
    h = jnp.dot(h, w3_ref[...], preferred_element_type=jnp.float32) + b3_ref[...]
    h = jnp.maximum(h, 0.0)

    # Final 128 -> 1 layer emitted lane-dense: contract the channel axis of w4^T (1,128)
    # with the channel axis of h (tile_rows,128) -> (1, tile_rows).
    out = jax.lax.dot_general(w4r_ref[...], h, (((1,), (1,)), ((), ())),
                              preferred_element_type=jnp.float32) + b4_ref[...]
    out_ref[...] = out.astype(out_ref.dtype)


def _choose_tile(bs, k_obstacle, target_rows=512):
    """Pick batches-per-tile so tile_rows = tile_b * k_obstacle is a multiple of 128
    (MXU / lane alignment) and tile_b is a multiple of 8 (sublane alignment)."""
    unit = max(8, 128 // math.gcd(128, k_obstacle))
    unit_rows = unit * k_obstacle
    n_units = max(1, target_rows // unit_rows)
    n_units = min(n_units, -(-bs // unit))           # don't exceed the (padded) batch
    tile_b = unit * n_units
    return tile_b, tile_b * k_obstacle


def cbf_forward(state, obstacle, params, *, target_rows=512):
    """
    state:    (bs, n_state)
    obstacle: (bs, k_obstacle, n_state)
    returns:  (bs, k_obstacle)
    """
    bs, n_state = state.shape
    _, k_obstacle, _ = obstacle.shape

    (w0, b0), (w1, b1), (w2, b2), (w3, b3), (w4, b4) = params

    # Zero-pad layer 0 (and the matching rows of w1) to a full 128-lane width; exact.
    h0 = w0.shape[1]
    h0p = -(-h0 // 128) * 128
    if h0p != h0:
        w0 = jnp.pad(w0, ((0, 0), (0, h0p - h0)))
        b0 = jnp.pad(b0, ((0, 0), (0, h0p - h0)))
        w1 = jnp.pad(w1, ((0, h0p - h0), (0, 0)))
    w4r = jnp.transpose(w4)                          # (1, 128): final layer as a row

    tile_b, tile_rows = _choose_tile(bs, k_obstacle, target_rows)
    num_tiles = -(-bs // tile_b)
    bs_pad = num_tiles * tile_b
    if bs_pad != bs:
        state = jnp.pad(state, ((0, bs_pad - bs), (0, 0)))
        obstacle = jnp.pad(obstacle, ((0, bs_pad - bs), (0, 0), (0, 0)))
    obs_rows = obstacle.reshape(bs_pad * k_obstacle, n_state)   # free leading-dim collapse
    Rp = bs_pad * k_obstacle

    def full(a):
        return pl.BlockSpec(a.shape, lambda i: (0, 0))

    out = pl.pallas_call(
        cbf_kernel,
        out_shape=jax.ShapeDtypeStruct((1, Rp), jnp.float32),
        grid_spec=pltpu.PrefetchScalarGridSpec(
            num_scalar_prefetch=0,
            grid=(num_tiles,),
            in_specs=[
                pl.BlockSpec((tile_b, n_state), lambda i: (i, 0)),      # state tile
                pl.BlockSpec((tile_rows, n_state), lambda i: (i, 0)),   # obstacle rows
                full(w0), full(b0), full(w1), full(b1),
                full(w2), full(b2), full(w3), full(b3),
                full(w4r), full(b4),
            ],
            out_specs=pl.BlockSpec((1, tile_rows), lambda i: (0, i)),
        ),
        compiler_params=pltpu.CompilerParams(
            dimension_semantics=("parallel",)),
    )(state, obs_rows, w0, b0, w1, b1, w2, b2, w3, b3, w4r, b4)

    return out[0, :bs * k_obstacle].reshape(bs, k_obstacle)


def init_params(key, n_state):
    """Deterministic init. Conv1d(in, out, 1) weights stored transposed as (in, out)."""
    dims = [(n_state, 64), (64, 128), (128, 128), (128, 128), (128, 1)]
    params = []
    for (din, dout) in dims:
        key, kw, kb = jax.random.split(key, 3)
        bound = 1.0 / jnp.sqrt(din)
        w = jax.random.uniform(kw, (din, dout), jnp.float32, -bound, bound)
        b = jax.random.uniform(kb, (1, dout), jnp.float32, -bound, bound)
        params.append((w, b))
    return params


def cbf_reference(state, obstacle, params):
    """Pure-JAX reference mirroring the PyTorch forward."""
    state_diff = state[:, None, :] - obstacle          # (bs, k, n_state)
    (w0, b0), (w1, b1), (w2, b2), (w3, b3), (w4, b4) = params
    h = jnp.maximum(state_diff @ w0 + b0, 0.0)
    h = jnp.maximum(h @ w1 + b1, 0.0)
    h = jnp.maximum(h @ w2 + b2, 0.0)
    h = jnp.maximum(h @ w3 + b3, 0.0)
    h = h @ w4 + b4                                    # (bs, k, 1)
    return h[..., 0]


if __name__ == "__main__":
    bs = 2
    n_state = 4
    k_obstacle = 8
    m_control = 2  # unused in forward

    key = jax.random.PRNGKey(0)
    k1, k2, k3 = jax.random.split(key, 3)
    state = jax.random.normal(k1, (bs, n_state), jnp.float32)
    obstacle = jax.random.normal(k2, (bs, k_obstacle, n_state), jnp.float32)
    params = init_params(k3, n_state)

    h = cbf_forward(state, obstacle, params)
    h = jax.block_until_ready(h)

    h_ref = cbf_reference(state, obstacle, params)
    assert h.shape == (bs, k_obstacle)
    assert jnp.allclose(h, h_ref, atol=1e-4, rtol=1e-4), "mismatch vs reference"

    print("KERNEL_OK")
</pallas_src>

<mosaic_0001>
module attributes {stable_mosaic.version = 11 : i64} {
  func.func @cbf_kernel(%arg0: i32, %arg1: memref<16x4xf32, #tpu.memory_space<vmem>>, %arg2: memref<128x4xf32, #tpu.memory_space<vmem>>, %arg3: memref<4x128xf32, #tpu.memory_space<vmem>>, %arg4: memref<1x128xf32, #tpu.memory_space<vmem>>, %arg5: memref<128x128xf32, #tpu.memory_space<vmem>>, %arg6: memref<1x128xf32, #tpu.memory_space<vmem>>, %arg7: memref<128x128xf32, #tpu.memory_space<vmem>>, %arg8: memref<1x128xf32, #tpu.memory_space<vmem>>, %arg9: memref<128x128xf32, #tpu.memory_space<vmem>>, %arg10: memref<1x128xf32, #tpu.memory_space<vmem>>, %arg11: memref<1x128xf32, #tpu.memory_space<vmem>>, %arg12: memref<1x1xf32, #tpu.memory_space<vmem>>, %arg13: memref<1x128xf32, #tpu.memory_space<vmem>>) attributes {dimension_semantics = [#tpu.dimension_semantics<parallel>], iteration_bounds = array<i64: 1>, scalar_prefetch = 0 : i64, scratch_operands = 0 : i64, tpu.core_type = #tpu.core_type<tc>, window_params = [{transform_indices = @transform_0, window_bounds = array<i64: 16, 4>}, {transform_indices = @transform_1, window_bounds = array<i64: 128, 4>}, {pipeline_mode = #tpu.pipeline_mode<synchronous>, transform_indices = @transform_2, window_bounds = array<i64: 4, 128>}, {pipeline_mode = #tpu.pipeline_mode<synchronous>, transform_indices = @transform_3, window_bounds = array<i64: 1, 128>}, {pipeline_mode = #tpu.pipeline_mode<synchronous>, transform_indices = @transform_4, window_bounds = array<i64: 128, 128>}, {pipeline_mode = #tpu.pipeline_mode<synchronous>, transform_indices = @transform_5, window_bounds = array<i64: 1, 128>}, {pipeline_mode = #tpu.pipeline_mode<synchronous>, transform_indices = @transform_6, window_bounds = array<i64: 128, 128>}, {pipeline_mode = #tpu.pipeline_mode<synchronous>, transform_indices = @transform_7, window_bounds = array<i64: 1, 128>}, {pipeline_mode = #tpu.pipeline_mode<synchronous>, transform_indices = @transform_8, window_bounds = array<i64: 128, 128>}, {pipeline_mode = #tpu.pipeline_mode<synchronous>, transform_indices = @transform_9, window_bounds = array<i64: 1, 128>}, {pipeline_mode = #tpu.pipeline_mode<synchronous>, transform_indices = @transform_10, window_bounds = array<i64: 1, 128>}, {pipeline_mode = #tpu.pipeline_mode<synchronous>, transform_indices = @transform_11, window_bounds = array<i64: 1, 1>}, {transform_indices = @transform_12, window_bounds = array<i64: 1, 128>}]} {
    %0 = tpu.iota {dimensions = array<i32: 0>} : vector<128x16xi32>
    %1 = tpu.iota {dimensions = array<i32: 1>} : vector<128x16xi32>
    %c8_i32 = arith.constant 8 : i32
    %2 = vector.broadcast %c8_i32 : i32 to vector<128x16xi32>
    %3 = arith.muli %1, %2 : vector<128x16xi32>
    %4 = arith.cmpi sge, %0, %3 : vector<128x16xi32>
    %c1_i32 = arith.constant 1 : i32
    %5 = vector.broadcast %c1_i32 : i32 to vector<128x16xi32>
    %6 = arith.addi %1, %5 : vector<128x16xi32>
    %c8_i32_0 = arith.constant 8 : i32
    %7 = vector.broadcast %c8_i32_0 : i32 to vector<128x16xi32>
    %8 = arith.muli %6, %7 : vector<128x16xi32>
    %9 = arith.cmpi slt, %0, %8 : vector<128x16xi32>
    %10 = arith.andi %4, %9 : vector<128x16xi1>
    %11 = arith.extui %10 : vector<128x16xi1> to vector<128x16xi32>
    %12 = arith.sitofp %11 : vector<128x16xi32> to vector<128x16xf32>
    %c0 = arith.constant 0 : index
    %c0_1 = arith.constant 0 : index
    %13 = vector.load %arg1[%c0, %c0_1] : memref<16x4xf32, #tpu.memory_space<vmem>>, vector<16x4xf32>
    %cst = arith.constant dense<0.000000e+00> : vector<128x4xf32>
    %14 = tpu.matmul %12, %13, %cst {dimension_numbers = #tpu.dot_dimension_numbers<[1], [0], [0], [1], [0, 0, 1, 1], [], []>} : vector<128x16xf32>, vector<16x4xf32>, vector<128x4xf32> -> vector<128x4xf32>
    %c0_2 = arith.constant 0 : index
    %c0_3 = arith.constant 0 : index
    %15 = vector.load %arg2[%c0_2, %c0_3] : memref<128x4xf32, #tpu.memory_space<vmem>>, vector<128x4xf32>
    %16 = arith.subf %14, %15 : vector<128x4xf32>
    %c0_4 = arith.constant 0 : index
    %c0_5 = arith.constant 0 : index
    %17 = vector.load %arg3[%c0_4, %c0_5] : memref<4x128xf32, #tpu.memory_space<vmem>>, vector<4x128xf32>
    %cst_6 = arith.constant dense<0.000000e+00> : vector<128x128xf32>
    %18 = tpu.matmul %16, %17, %cst_6 {dimension_numbers = #tpu.dot_dimension_numbers<[1], [0], [0], [1], [0, 0, 1, 1], [], []>} : vector<128x4xf32>, vector<4x128xf32>, vector<128x128xf32> -> vector<128x128xf32>
    %c0_7 = arith.constant 0 : index
    %c0_8 = arith.constant 0 : index
    %19 = vector.load %arg4[%c0_7, %c0_8] : memref<1x128xf32, #tpu.memory_space<vmem>>, vector<1x128xf32>
    %20 = vector.broadcast %19 : vector<1x128xf32> to vector<128x128xf32>
    %21 = arith.addf %18, %20 : vector<128x128xf32>
    %cst_9 = arith.constant 0.000000e+00 : f32
    %22 = vector.broadcast %cst_9 : f32 to vector<128x128xf32>
    %23 = arith.maximumf %21, %22 : vector<128x128xf32>
    %c0_10 = arith.constant 0 : index
    %c0_11 = arith.constant 0 : index
    %24 = vector.load %arg5[%c0_10, %c0_11] : memref<128x128xf32, #tpu.memory_space<vmem>>, vector<128x128xf32>
    %cst_12 = arith.constant dense<0.000000e+00> : vector<128x128xf32>
    %25 = tpu.matmul %23, %24, %cst_12 {dimension_numbers = #tpu.dot_dimension_numbers<[1], [0], [0], [1], [0, 0, 1, 1], [], []>} : vector<128x128xf32>, vector<128x128xf32>, vector<128x128xf32> -> vector<128x128xf32>
    %c0_13 = arith.constant 0 : index
    %c0_14 = arith.constant 0 : index
    %26 = vector.load %arg6[%c0_13, %c0_14] : memref<1x128xf32, #tpu.memory_space<vmem>>, vector<1x128xf32>
    %27 = vector.broadcast %26 : vector<1x128xf32> to vector<128x128xf32>
    %28 = arith.addf %25, %27 : vector<128x128xf32>
    %cst_15 = arith.constant 0.000000e+00 : f32
    %29 = vector.broadcast %cst_15 : f32 to vector<128x128xf32>
    %30 = arith.maximumf %28, %29 : vector<128x128xf32>
    %c0_16 = arith.constant 0 : index
    %c0_17 = arith.constant 0 : index
    %31 = vector.load %arg7[%c0_16, %c0_17] : memref<128x128xf32, #tpu.memory_space<vmem>>, vector<128x128xf32>
    %cst_18 = arith.constant dense<0.000000e+00> : vector<128x128xf32>
    %32 = tpu.matmul %30, %31, %cst_18 {dimension_numbers = #tpu.dot_dimension_numbers<[1], [0], [0], [1], [0, 0, 1, 1], [], []>} : vector<128x128xf32>, vector<128x128xf32>, vector<128x128xf32> -> vector<128x128xf32>
    %c0_19 = arith.constant 0 : index
    %c0_20 = arith.constant 0 : index
    %33 = vector.load %arg8[%c0_19, %c0_20] : memref<1x128xf32, #tpu.memory_space<vmem>>, vector<1x128xf32>
    %34 = vector.broadcast %33 : vector<1x128xf32> to vector<128x128xf32>
    %35 = arith.addf %32, %34 : vector<128x128xf32>
    %cst_21 = arith.constant 0.000000e+00 : f32
    %36 = vector.broadcast %cst_21 : f32 to vector<128x128xf32>
    %37 = arith.maximumf %35, %36 : vector<128x128xf32>
    %c0_22 = arith.constant 0 : index
    %c0_23 = arith.constant 0 : index
    %38 = vector.load %arg9[%c0_22, %c0_23] : memref<128x128xf32, #tpu.memory_space<vmem>>, vector<128x128xf32>
    %cst_24 = arith.constant dense<0.000000e+00> : vector<128x128xf32>
    %39 = tpu.matmul %37, %38, %cst_24 {dimension_numbers = #tpu.dot_dimension_numbers<[1], [0], [0], [1], [0, 0, 1, 1], [], []>} : vector<128x128xf32>, vector<128x128xf32>, vector<128x128xf32> -> vector<128x128xf32>
    %c0_25 = arith.constant 0 : index
    %c0_26 = arith.constant 0 : index
    %40 = vector.load %arg10[%c0_25, %c0_26] : memref<1x128xf32, #tpu.memory_space<vmem>>, vector<1x128xf32>
    %41 = vector.broadcast %40 : vector<1x128xf32> to vector<128x128xf32>
    %42 = arith.addf %39, %41 : vector<128x128xf32>
    %cst_27 = arith.constant 0.000000e+00 : f32
    %43 = vector.broadcast %cst_27 : f32 to vector<128x128xf32>
    %44 = arith.maximumf %42, %43 : vector<128x128xf32>
    %c0_28 = arith.constant 0 : index
    %c0_29 = arith.constant 0 : index
    %45 = vector.load %arg11[%c0_28, %c0_29] : memref<1x128xf32, #tpu.memory_space<vmem>>, vector<1x128xf32>
    %cst_30 = arith.constant dense<0.000000e+00> : vector<1x128xf32>
    %46 = tpu.matmul %45, %44, %cst_30 {dimension_numbers = #tpu.dot_dimension_numbers<[1], [1], [0], [0], [0, 0, 1, 0], [], []>} : vector<1x128xf32>, vector<128x128xf32>, vector<1x128xf32> -> vector<1x128xf32>
    %c0_31 = arith.constant 0 : index
    %c0_32 = arith.constant 0 : index
    %47 = vector.load %arg12[%c0_31, %c0_32] : memref<1x1xf32, #tpu.memory_space<vmem>>, vector<1x1xf32>
    %48 = vector.broadcast %47 : vector<1x1xf32> to vector<1x128xf32>
    %49 = arith.addf %46, %48 : vector<1x128xf32>
    %c0_33 = arith.constant 0 : index
    %c0_34 = arith.constant 0 : index
    %50 = vector.load %arg13[%c0_33, %c0_34] : memref<1x128xf32, #tpu.memory_space<vmem>>, vector<1x128xf32>
    tpu.vector_store %arg13[%c0_33, %c0_34], %49 {strides = array<i32>} : memref<1x128xf32, #tpu.memory_space<vmem>>, vector<1x128xf32>,
    return
  }
  func.func @transform_0(%arg0: i32) -> (i32, i32) {
    %c0_i32 = arith.constant 0 : i32
    %c0_i32_0 = arith.constant 0 : i32
    return %arg0, %c0_i32 : i32, i32
  }
  func.func @transform_1(%arg0: i32) -> (i32, i32) {
    %c0_i32 = arith.constant 0 : i32
    %c0_i32_0 = arith.constant 0 : i32
    return %arg0, %c0_i32 : i32, i32
  }
  func.func @transform_2(%arg0: i32) -> (i32, i32) {
    %c0_i32 = arith.constant 0 : i32
    %c0_i32_0 = arith.constant 0 : i32
    %c0_i32_1 = arith.constant 0 : i32
    return %c0_i32, %c0_i32_0 : i32, i32
  }
  func.func @transform_3(%arg0: i32) -> (i32, i32) {
    %c0_i32 = arith.constant 0 : i32
    %c0_i32_0 = arith.constant 0 : i32
    %c0_i32_1 = arith.constant 0 : i32
    return %c0_i32, %c0_i32_0 : i32, i32
  }
  func.func @transform_4(%arg0: i32) -> (i32, i32) {
    %c0_i32 = arith.constant 0 : i32
    %c0_i32_0 = arith.constant 0 : i32
    %c0_i32_1 = arith.constant 0 : i32
    return %c0_i32, %c0_i32_0 : i32, i32
  }
  func.func @transform_5(%arg0: i32) -> (i32, i32) {
    %c0_i32 = arith.constant 0 : i32
    %c0_i32_0 = arith.constant 0 : i32
    %c0_i32_1 = arith.constant 0 : i32
    return %c0_i32, %c0_i32_0 : i32, i32
  }
  func.func @transform_6(%arg0: i32) -> (i32, i32) {
    %c0_i32 = arith.constant 0 : i32
    %c0_i32_0 = arith.constant 0 : i32
    %c0_i32_1 = arith.constant 0 : i32
    return %c0_i32, %c0_i32_0 : i32, i32
  }
  func.func @transform_7(%arg0: i32) -> (i32, i32) {
    %c0_i32 = arith.constant 0 : i32
    %c0_i32_0 = arith.constant 0 : i32
    %c0_i32_1 = arith.constant 0 : i32
    return %c0_i32, %c0_i32_0 : i32, i32
  }
  func.func @transform_8(%arg0: i32) -> (i32, i32) {
    %c0_i32 = arith.constant 0 : i32
    %c0_i32_0 = arith.constant 0 : i32
    %c0_i32_1 = arith.constant 0 : i32
    return %c0_i32, %c0_i32_0 : i32, i32
  }
  func.func @transform_9(%arg0: i32) -> (i32, i32) {
    %c0_i32 = arith.constant 0 : i32
    %c0_i32_0 = arith.constant 0 : i32
    %c0_i32_1 = arith.constant 0 : i32
    return %c0_i32, %c0_i32_0 : i32, i32
  }
  func.func @transform_10(%arg0: i32) -> (i32, i32) {
    %c0_i32 = arith.constant 0 : i32
    %c0_i32_0 = arith.constant 0 : i32
    %c0_i32_1 = arith.constant 0 : i32
    return %c0_i32, %c0_i32_0 : i32, i32
  }
  func.func @transform_11(%arg0: i32) -> (i32, i32) {
    %c0_i32 = arith.constant 0 : i32
    %c0_i32_0 = arith.constant 0 : i32
    %c0_i32_1 = arith.constant 0 : i32
    return %c0_i32, %c0_i32_0 : i32, i32
  }
  func.func @transform_12(%arg0: i32) -> (i32, i32) {
    %c0_i32 = arith.constant 0 : i32
    %c0_i32_0 = arith.constant 0 : i32
    return %c0_i32, %arg0 : i32, i32
  }
}

</mosaic_0001>

<bundles_post_ra>
// kernel: tpu_custom_call.1
= control target key start
LH: loop header
LB: loop body
LE: loop exit
PB: predicated region body
PF: predicated region fallthrough
CT: control target
= control target key end

     0   :  { %s1313_s0 = inlined_call_operand.vmem [shape: f32[16,4], index: 0, kind: input, shape index: {}]   ;;  %s1314_s1 = inlined_call_operand.vmem [shape: f32[128,4], index: 1, kind: input, shape index: {}]   ;;  %s1315_s2 = inlined_call_operand.vmem [shape: f32[4,128], index: 2, kind: input, shape index: {}]   ;;  %s1316_s3 = inlined_call_operand.vmem [shape: f32[1,128], index: 3, kind: input, shape index: {}]   ;;  %s1317_s4 = inlined_call_operand.vmem [shape: f32[128,128], index: 4, kind: input, shape index: {}]   ;;  %s1318_s5 = inlined_call_operand.vmem [shape: f32[1,128], index: 5, kind: input, shape index: {}]   ;;  %s1319_s6 = inlined_call_operand.hbm [shape: f32[128,128], index: 6, kind: input, shape index: {}]   ;;  %s1320_s7 = inlined_call_operand.vmem [shape: f32[1,128], index: 7, kind: input, shape index: {}]   ;;  %s1321_s8 = inlined_call_operand.hbm [shape: f32[128,128], index: 8, kind: input, shape index: {}]   ;;  %s1322_s9 = inlined_call_operand.vmem [shape: f32[1,128], index: 9, kind: input, shape index: {}]   ;;  %s1323_s10 = inlined_call_operand.vmem [shape: f32[1,128], index: 10, kind: input, shape index: {}]   ;;  %s1324_s11 = inlined_call_operand.<no memory space> [shape: f32[1,1], index: 11, kind: input, shape index: {}]   ;;  %s1325_s12 = inlined_call_operand.hbm [shape: f32[1,128], index: 12, kind: output, shape index: {}]  }
   0x1   :  { %v17_v0 = vstv %s1324_s11 }
   0x2   :  { %18 = vst [vmem:[#allocation2] sm:$0x1] %v17_v0 }
   0x3   :  { %19 = vsyncpa [#allocation4], 0 }
   0x4   :  { %20 = vsyncpa [#allocation7], 0 }
   0x5   :  { %21 = vsyncpa [#allocation5], 0  ;;  %s38_s25 = sshll.u32 %s1319_s6, 4  ;;  %s958_s26 = smov [#allocation3]   ;;  %s39_s25 = int_to_ptr.hbm [resolvable:$true] %s38_s25 }
   0x6   :  { %s40_s27 = sshll.u32 %s958_s26, 4  ;;  %s53_s30 = sshll.u32 %s1321_s8, 4  ;;  %s41_s27 = int_to_ptr.vmem [resolvable:$true] %s40_s27  ;;  %s54_s30 = int_to_ptr.hbm [resolvable:$true] %s53_s30 }
   0x7   :  { %s959_s13 = smov 128   ;;  %s960_s14 = smov 8  }
   0x8   :  { %46 = dma.hbm_to_vmem [thread:$0]  %s39_s25, 2048, %s41_s27, [#allocation4], %s959_s13, %s959_s13, %s960_s14  }
   0x9   :  { %s961_s11 = smov [#allocation6]  }
   0xa   :  { %s55_s15 = sshll.u32 %s961_s11, 4  ;;  %s56_s15 = int_to_ptr.vmem [resolvable:$true] %s55_s15 }
   0xb   :  { %61 = dma.hbm_to_vmem [thread:$0]  %s54_s30, 2048, %s56_s15, [#allocation7], %s959_s13, %s959_s13, %s960_s14  }
   0xc   :  { %952 = dma.done.wait [#allocation4], 2048  }
   0xd   :  { %953 = vsyncadd [#allocation4], 4294965248 }
   0xe   :  { %954 = dma.done.wait [#allocation7], 2048  }
   0xf   :  { %955 = vsyncadd [#allocation7], 4294965248  ;;  %v76_v1 = vlaneseq  ;;  %v179_v8 = vld [vmem:[%s1313_s0 + $0x8] sm:$0xff]  ;;  %v178_v9 = vld [vmem:[%s1313_s0] sm:$0xff]  ;;  %vm180_vm1 = vcmask 130048   ;;  %v962_v10 = vmov 0.0  }
  0x10   :  { %243 = vmatpush.msra.mxu0 %v179_v8  ;;  %864 = vmatpush.msra.mxu2 %v179_v8  ;;  %v326_v35 = vld [vmem:[%s1315_s2] sm:$0xf]  ;;  %v295_v46 = vld [vmem:[%s1314_s1 + $0x8] sm:$0xff]  ;;  %v296_v49 = vld [vmem:[%s1314_s1 + $0x10] sm:$0xff]  ;;  %s964_s18 = smov [#allocation8]   ;;  %s804_s21 = sshll.u32 %s1325_s12, 4  ;;  %s805_s21 = int_to_ptr.hbm [resolvable:$true] %s804_s21 }
  0x11   :  { %v1039_v2 = vshrl.u32 %v76_v1, 7  ;;  %v94_v3 = vand.u32 127, %v76_v1  ;;  %v294_v43 = vld [vmem:[%s1314_s1] sm:$0xff]  ;;  %v297_v52 = vld [vmem:[%s1314_s1 + $0x18] sm:$0xff]  ;;  %v299_v58 = vld [vmem:[%s1314_s1 + $0x28] sm:$0xff]  ;;  %s802_s2 = sshll.u32 %s964_s18, 4  ;;  %s803_s2 = int_to_ptr.vmem [resolvable:$true] %s802_s2 }
  0x12   :  { %244 = vmatpush.msra.mxu0 %v178_v9  ;;  %865 = vmatpush.msra.mxu2 %v178_v9  ;;  %v298_v55 = vld [vmem:[%s1314_s1 + $0x20] sm:$0xff]  ;;  %v300_v61 = vld [vmem:[%s1314_s1 + $0x30] sm:$0xff]  ;;  %v301_v1 = vld [vmem:[%s1314_s1 + $0x38] sm:$0xff] }
  0x13   :  { %v1041_v4 = vmul.u32 8, %v94_v3  ;;  %v112_v5 = vadd.s32 1, %v94_v3  ;;  %v78_v7 = vadd.s32 8, %v1039_v2  ;;  %v79_v12 = vadd.s32 16, %v1039_v2  ;;  %v468_v37 = vld [vmem:[%s1317_s4 + $0x18] sm:$0xff] }
  0x14   :  { %v80_v14 = vadd.s32 24, %v1039_v2  ;;  %v81_v16 = vadd.s32 32, %v1039_v2  ;;  %v85_v18 = vadd.s32 64, %v1039_v2  ;;  %v82_v19 = vadd.s32 40, %v1039_v2 }
  0x15   :  { %vm96_vm0 = vcmp.ge.s32.totalorder %v1039_v2, %v1041_v4  ;;  %v1045_v6 = vmul.u32 8, %v112_v5  ;;  %vm97_vm4 = vcmp.ge.s32.totalorder %v78_v7, %v1041_v4  ;;  %vm98_vm7 = vcmp.ge.s32.totalorder %v79_v12, %v1041_v4  ;;  %v302_v5 = vld [vmem:[%s1314_s1 + $0x40] sm:$0xff] }
  0x16   :  { %vm99_vm10 = vcmp.ge.s32.totalorder %v80_v14, %v1041_v4  ;;  %vm100_vm13 = vcmp.ge.s32.totalorder %v81_v16, %v1041_v4  ;;  %v86_v22 = vadd.s32 72, %v1039_v2  ;;  %v83_v23 = vadd.s32 48, %v1039_v2 }
  0x17   :  { %vm114_vm2 = vcmp.lt.s32.totalorder %v1039_v2, %v1045_v6  ;;  %vm115_vm5 = vcmp.lt.s32.totalorder %v78_v7, %v1045_v6  ;;  %vm116_vm8 = vcmp.lt.s32.totalorder %v79_v12, %v1045_v6  ;;  %vm117_vm11 = vcmp.lt.s32.totalorder %v80_v14, %v1045_v6  ;;  %v307_v7 = vld [vmem:[%s1314_s1 + $0x68] sm:$0xff]  ;;  %v479_v12 = vld [vmem:[%s1317_s4 + $0x70] sm:$0xff] }
  0x18   :  { %vm130_vm3 = vmand %vm96_vm0, %vm114_vm2  ;;  %vm118_vm14 = vcmp.lt.s32.totalorder %v81_v16, %v1045_v6  ;;  %vm104_vm0 = vcmp.ge.s32.totalorder %v85_v18, %v1041_v4  ;;  %vm122_vm2 = vcmp.lt.s32.totalorder %v85_v18, %v1045_v6  ;;  %v88_v26 = vadd.s32 88, %v1039_v2  ;;  %v303_v14 = vld [vmem:[%s1314_s1 + $0x48] sm:$0xff] }
  0x19   :  { %v815_v11 = vsel %vm130_vm3, 1.0, %v962_v10  ;;  %vm131_vm6 = vmand %vm97_vm4, %vm115_vm5  ;;  %vm101_vm4 = vcmp.ge.s32.totalorder %v82_v19, %v1041_v4  ;;  %vm119_vm5 = vcmp.lt.s32.totalorder %v82_v19, %v1045_v6  ;;  %v87_v27 = vadd.s32 80, %v1039_v2  ;;  %v476_v19 = vld [vmem:[%s1317_s4 + $0x58] sm:$0xff] }
  0x1a   :  { %831 = vmatmul.msk.f32.vlgmr.msra.gmra.mxu0 %vm180_vm1, %v815_v11  ;;  %v816_v13 = vsel %vm131_vm6, 1.0, %v962_v10  ;;  %vm132_vm9 = vmand %vm98_vm7, %vm116_vm8  ;;  %vm105_vm7 = vcmp.ge.s32.totalorder %v86_v22, %v1041_v4  ;;  %vm123_vm8 = vcmp.lt.s32.totalorder %v86_v22, %v1045_v6  ;;  %v84_v28 = vadd.s32 56, %v1039_v2  ;;  %v480_v11 = vld [vmem:[%s1317_s4 + $0x78] sm:$0xff]  ;;  %v475_v22 = vld [vmem:[%s1317_s4 + $0x50] sm:$0xff] }
  0x1b   :  { %v817_v15 = vsel %vm132_vm9, 1.0, %v962_v10  ;;  %vm133_vm12 = vmand %vm99_vm10, %vm117_vm11  ;;  %vm102_vm10 = vcmp.ge.s32.totalorder %v83_v23, %v1041_v4  ;;  %vm120_vm11 = vcmp.lt.s32.totalorder %v83_v23, %v1045_v6  ;;  %v89_v32 = vadd.s32 96, %v1039_v2  ;;  %485 = vmatpush.msrb.mxu2 %v480_v11  ;;  %v474_v23 = vld [vmem:[%s1317_s4 + $0x48] sm:$0xff]  ;;  %v580_v11 = vld [vmem:[#allocation3 + $0x70] sm:$0xff] }
  0x1c   :  { %v818_v17 = vsel %vm133_vm12, 1.0, %v962_v10  ;;  %vm134_vm15 = vmand %vm100_vm13, %vm118_vm14  ;;  %vm107_vm13 = vcmp.ge.s32.totalorder %v88_v26, %v1041_v4  ;;  %vm125_vm14 = vcmp.lt.s32.totalorder %v88_v26, %v1045_v6  ;;  %v90_v33 = vadd.s32 104, %v1039_v2 }
  0x1d   :  { %vm138_vm3 = vmand %vm104_vm0, %vm122_vm2  ;;  %v819_v21 = vsel %vm134_vm15, 1.0, %v962_v10  ;;  %vm106_vm0 = vcmp.ge.s32.totalorder %v87_v27, %v1041_v4  ;;  %vm124_vm2 = vcmp.lt.s32.totalorder %v87_v27, %v1045_v6  ;;  %v91_v34 = vadd.s32 112, %v1039_v2  ;;  %486 = vmatpush.msrb.mxu2 %v479_v12  ;;  %v309_v27 = vld [vmem:[%s1314_s1 + $0x78] sm:$0xff]  ;;  %v579_v12 = vld [vmem:[#allocation3 + $0x68] sm:$0xff] }
  0x1e   :  { %v1080_v20 = vsel %vm138_vm3, 1.0, %v962_v10  ;;  %vm135_vm6 = vmand %vm101_vm4, %vm119_vm5  ;;  %vm103_vm4 = vcmp.ge.s32.totalorder %v84_v28, %v1041_v4  ;;  %vm121_vm5 = vcmp.lt.s32.totalorder %v84_v28, %v1045_v6  ;;  %v92_v36 = vadd.s32 120, %v1039_v2 }
  0x1f   :  { %vm139_vm9 = vmand %vm105_vm7, %vm123_vm8  ;;  %v820_v25 = vsel %vm135_vm6, 1.0, %v962_v10  ;;  %vm380_vm6 = vcmask 1043456   ;;  %vm108_vm8 = vcmp.ge.s32.totalorder %v89_v32, %v1041_v4 }
  0x20   :  { %v824_v24 = vsel %vm139_vm9, 1.0, %v962_v10  ;;  %vm136_vm12 = vmand %vm102_vm10, %vm120_vm11  ;;  %vm126_vm9 = vcmp.lt.s32.totalorder %v89_v32, %v1045_v6  ;;  %847 = vmatpush.msk.msrb.mxu0 %vm380_vm6, %v326_v35  ;;  %866 = vmatpush.msk.msra.mxu1 %vm380_vm6, %v326_v35  ;;  %vm109_vm11 = vcmp.ge.s32.totalorder %v90_v33, %v1041_v4  ;;  %v471_v32 = vld [vmem:[%s1317_s4 + $0x30] sm:$0xff] }
  0x21   :  { %vm141_vm15 = vmand %vm107_vm13, %vm125_vm14  ;;  %v821_v31 = vsel %vm136_vm12, 1.0, %v962_v10  ;;  %vm110_vm12 = vcmp.ge.s32.totalorder %v91_v34, %v1041_v4  ;;  %vm128_vm13 = vcmp.lt.s32.totalorder %v91_v34, %v1045_v6  ;;  %867 = vmatpush.msk.msra.mxu3 %vm380_vm6, %v326_v35  ;;  %vm127_vm14 = vcmp.lt.s32.totalorder %v90_v33, %v1045_v6  ;;  %v470_v33 = vld [vmem:[%s1317_s4 + $0x28] sm:$0xff]  ;;  %v305_v34 = vld [vmem:[%s1314_s1 + $0x58] sm:$0xff] }
  0x22   :  { %832 = vmatmul.msk.f32.gmra.mxu0 %vm180_vm1, %v816_v13  ;;  %v826_v29 = vsel %vm141_vm15, 1.0, %v962_v10  ;;  %vm140_vm3 = vmand %vm106_vm0, %vm124_vm2  ;;  %vm111_vm15 = vcmp.ge.s32.totalorder %v92_v36, %v1041_v4  ;;  %vm129_vm0 = vcmp.lt.s32.totalorder %v92_v36, %v1045_v6  ;;  %v478_v13 = vld [vmem:[%s1317_s4 + $0x68] sm:$0xff]  ;;  %v469_v35 = vld [vmem:[%s1317_s4 + $0x20] sm:$0xff] }
  0x23   :  { %842 = vmatmul.msk.f32.vlgmr.msra.gmra.mxu2 %vm180_vm1, %v826_v29  ;;  %v825_v30 = vsel %vm140_vm3, 1.0, %v962_v10  ;;  %vm1116_vm7 = vmand %vm103_vm4, %vm121_vm5  ;;  %vm331_vm5 = vcmask 31744   ;;  %v472_v29 = vld [vmem:[%s1317_s4 + $0x38] sm:$0xff] }
  0x24   :  { %vm142_vm10 = vmand %vm108_vm8, %vm126_vm9  ;;  %v822_v39 = vsel %vm1116_vm7, 1.0, %v962_v10  ;;  %487 = vmatpush.msrb.mxu2 %v478_v13 }
  0x25   :  { %v827_v38 = vsel %vm142_vm10, 1.0, %v962_v10  ;;  %vm144_vm2 = vmand %vm110_vm12, %vm128_vm13 }
  0x26   :  { %v829_v40 = vsel %vm144_vm2, 1.0, %v962_v10  ;;  %vm145_vm3 = vmand %vm111_vm15, %vm129_vm0 }
  0x27   :  { %vm143_vm4 = vmand %vm109_vm11, %vm127_vm14  ;;  %v830_v41 = vsel %vm145_vm3, 1.0, %v962_v10 }
  0x28   :  { %v828_v42 = vsel %vm143_vm4, 1.0, %v962_v10 }
  0x2a   :  { %833 = vmatmul.msk.f32.gmra.mxu0 %vm180_vm1, %v817_v15  ;;  %v477_v15 = vld [vmem:[%s1317_s4 + $0x60] sm:$0xff] }
  0x2b   :  { %843 = vmatmul.msk.f32.gmra.mxu2 %vm180_vm1, %v827_v38  ;;  %v306_v38 = vld [vmem:[%s1314_s1 + $0x60] sm:$0xff] }
  0x2c   :  { %488 = vmatpush.msrb.mxu2 %v477_v15  ;;  %v578_v15 = vld [vmem:[#allocation3 + $0x60] sm:$0xff] }
  0x2e   :  { %489 = vmatpush.msrb.mxu2 %v476_v19  ;;  %v575_v19 = vld [vmem:[#allocation3 + $0x48] sm:$0xff] }
  0x30   :  { %490 = vmatpush.msrb.mxu2 %v475_v22  ;;  %v574_v22 = vld [vmem:[#allocation3 + $0x40] sm:$0xff] }
  0x32   :  { %834 = vmatmul.msk.f32.gmra.mxu0 %vm180_vm1, %v818_v17  ;;  %v308_v17 = vld [vmem:[%s1314_s1 + $0x70] sm:$0xff]  ;;  %491 = vmatpush.msrb.mxu2 %v474_v23 }
  0x33   :  { %844 = vmatmul.msk.f32.gmra.mxu2 %vm180_vm1, %v828_v42  ;;  %v465_v42 = vld [vmem:[%s1317_s4] sm:$0xff] }
  0x3a   :  { %835 = vmatmul.msk.f32.gmra.mxu0 %vm180_vm1, %v819_v21 }
  0x3b   :  { %845 = vmatmul.msk.f32.gmra.mxu2 %vm180_vm1, %v829_v40 }
  0x42   :  { %836 = vmatmul.msk.f32.gmra.mxu0 %vm180_vm1, %v820_v25  ;;  %v473_v25 = vld [vmem:[%s1317_s4 + $0x40] sm:$0xff] }
  0x43   :  { %846 = vmatmul.msk.f32.gmra.mxu2 %vm180_vm1, %v830_v41  ;;  %v466_v41 = vld [vmem:[%s1317_s4 + $0x8] sm:$0xff] }
  0x44   :  { %492 = vmatpush.msrb.mxu2 %v473_v25  ;;  %v572_v25 = vld [vmem:[#allocation3 + $0x30] sm:$0xff] }
  0x46   :  { %493 = vmatpush.msrb.mxu2 %v472_v29 }
  0x48   :  { %494 = vmatpush.msrb.mxu2 %v471_v32  ;;  %v569_v32 = vld [vmem:[#allocation3 + $0x18] sm:$0xff] }
  0x4a   :  { %837 = vmatmul.msk.f32.gmra.mxu0 %vm180_vm1, %v821_v31  ;;  %495 = vmatpush.msrb.mxu2 %v470_v33 }
  0x4c   :  { %496 = vmatpush.msrb.mxu2 %v469_v35 }
  0x4e   :  { %497 = vmatpush.msrb.mxu2 %v468_v37  ;;  %v567_v37 = vld [vmem:[#allocation3 + $0x8] sm:$0xff] }
  0x52   :  { %838 = vmatmul.msk.f32.gmra.mxu0 %vm180_vm1, %v822_v39  ;;  %v467_v39 = vld [vmem:[%s1317_s4 + $0x10] sm:$0xff] }
  0x53   :  { %498 = vmatpush.msrb.mxu2 %v467_v39 }
  0x55   :  { %499 = vmatpush.msrb.mxu2 %v466_v41 }
  0x57   :  { %500 = vmatpush.msrb.mxu2 %v465_v42 }
  0x5a   :  { %839 = vmatmul.msk.f32.gmra.mxu0 %vm180_vm1, %v1080_v20 }
  0x62   :  { %840 = vmatmul.msk.f32.gmra.mxu0 %vm180_vm1, %v824_v24  ;;  %v304_v24 = vld [vmem:[%s1314_s1 + $0x50] sm:$0xff] }
  0x6a   :  { %841 = vmatmul.msk.f32.gmra.mxu0 %vm180_vm1, %v825_v30 }
  0x97   :  { %v246_v44 = vpop.f32.mrf.mxu0 }
  0x98   :  { %v310_v45 = vsub.f32 %v246_v44, %v294_v43  ;;  %v1259_v43 = vld [vmem:[%s1316_s3] ss:$0 sm:$0xff] }
  0x9a   :  { %848 = vmatmul.msk.f32.vlgmr.msrb.gmra.mxu0 %vm331_vm5, %v310_v45 }
  0x9f   :  { %v249_v47 = vpop.f32.mrf.mxu0 }
  0xa0   :  { %v311_v48 = vsub.f32 %v249_v47, %v295_v46 }
  0xa2   :  { %849 = vmatmul.msk.f32.gmra.mxu0 %vm331_vm5, %v311_v48 }
  0xa6   :  { %v279_v0 = vpop.f32.mrf.mxu2 }
  0xa7   :  { %v252_v50 = vpop.f32.mrf.mxu0  ;;  %v321_v36 = vsub.f32 %v279_v0, %v305_v34  ;;  %v568_v34 = vld [vmem:[#allocation3 + $0x10] sm:$0xff] }
  0xa8   :  { %v312_v51 = vsub.f32 %v252_v50, %v296_v49 }
  0xaa   :  { %850 = vmatmul.msk.f32.gmra.mxu0 %vm331_vm5, %v312_v51 }
  0xae   :  { %v282_v4 = vpop.f32.mrf.mxu2 }
  0xaf   :  { %v255_v53 = vpop.f32.mrf.mxu0  ;;  %v322_v40 = vsub.f32 %v282_v4, %v306_v38  ;;  %v566_v38 = vld [vmem:[#allocation3] sm:$0xff] }
  0xb0   :  { %v313_v54 = vsub.f32 %v255_v53, %v297_v52 }
  0xb2   :  { %851 = vmatmul.msk.f32.gmra.mxu0 %vm331_vm5, %v313_v54 }
  0xb6   :  { %v285_v9 = vpop.f32.mrf.mxu2 }
  0xb7   :  { %v258_v56 = vpop.f32.mrf.mxu0  ;;  %v323_v10 = vsub.f32 %v285_v9, %v307_v7 }
  0xb8   :  { %v314_v57 = vsub.f32 %v258_v56, %v298_v55 }
  0xb9   :  { %861 = vmatmul.msk.f32.vlgmr.msra.gmra.mxu3 %vm331_vm5, %v323_v10  ;;  %v581_v10 = vld [vmem:[#allocation3 + $0x78] sm:$0xff] }
  0xba   :  { %852 = vmatmul.msk.f32.gmra.mxu0 %vm331_vm5, %v314_v57  ;;  %586 = vmatpush.msrb.mxu3 %v581_v10 }
  0xbc   :  { %587 = vmatpush.msrb.mxu3 %v580_v11  ;;  %v682_v11 = vld [vmem:[#allocation6 + $0x78] sm:$0xff] }
  0xbd   :  { %687 = vmatpush.msrb.mxu1 %v682_v11 }
  0xbe   :  { %v288_v20 = vpop.f32.mrf.mxu2  ;;  %588 = vmatpush.msrb.mxu3 %v579_v12  ;;  %v681_v12 = vld [vmem:[#allocation6 + $0x70] sm:$0xff] }
  0xbf   :  { %v261_v59 = vpop.f32.mrf.mxu0  ;;  %v324_v21 = vsub.f32 %v288_v20, %v308_v17  ;;  %v577_v17 = vld [vmem:[#allocation3 + $0x58] sm:$0xff]  ;;  %688 = vmatpush.msrb.mxu1 %v681_v12 }
  0xc0   :  { %v315_v60 = vsub.f32 %v261_v59, %v299_v58  ;;  %589 = vmatpush.msrb.mxu3 %v578_v15  ;;  %v680_v15 = vld [vmem:[#allocation6 + $0x68] sm:$0xff] }
  0xc1   :  { %862 = vmatmul.msk.f32.gmra.mxu3 %vm331_vm5, %v324_v21  ;;  %689 = vmatpush.msrb.mxu1 %v680_v15 }
  0xc2   :  { %853 = vmatmul.msk.f32.gmra.mxu0 %vm331_vm5, %v315_v60  ;;  %590 = vmatpush.msrb.mxu3 %v577_v17  ;;  %v679_v17 = vld [vmem:[#allocation6 + $0x60] sm:$0xff] }
  0xc3   :  { %690 = vmatpush.msrb.mxu1 %v679_v17 }
  0xc6   :  { %v291_v30 = vpop.f32.mrf.mxu2 }
  0xc7   :  { %v264_v62 = vpop.f32.mrf.mxu0  ;;  %v325_v31 = vsub.f32 %v291_v30, %v309_v27  ;;  %v571_v27 = vld [vmem:[#allocation3 + $0x28] sm:$0xff]  ;;  %v570_v30 = vld [vmem:[#allocation3 + $0x20] sm:$0xff] }
  0xc8   :  { %v316_v63 = vsub.f32 %v264_v62, %v300_v61 }
  0xc9   :  { %863 = vmatmul.msk.f32.gmra.mxu3 %vm331_vm5, %v325_v31 }
  0xca   :  { %854 = vmatmul.msk.f32.gmra.mxu0 %vm331_vm5, %v316_v63 }
  0xcf   :  { %v267_v2 = vpop.f32.mrf.mxu0 }
  0xd0   :  { %v317_v3 = vsub.f32 %v267_v2, %v301_v1 }
  0xd2   :  { %855 = vmatmul.msk.f32.gmra.mxu0 %vm331_vm5, %v317_v3 }
  0xd7   :  { %v270_v6 = vpop.f32.mrf.mxu0 }
  0xd8   :  { %v318_v8 = vsub.f32 %v270_v6, %v302_v5 }
  0xda   :  { %856 = vmatmul.msk.f32.gmra.mxu0 %vm331_vm5, %v318_v8 }
  0xdf   :  { %v273_v16 = vpop.f32.mrf.mxu0 }
  0xe0   :  { %v319_v18 = vsub.f32 %v273_v16, %v303_v14 }
  0xe2   :  { %857 = vmatmul.msk.f32.vlgmr.msra.gmra.mxu1 %vm331_vm5, %v319_v18  ;;  %v576_v18 = vld [vmem:[#allocation3 + $0x50] sm:$0xff] }
  0xe3   :  { %591 = vmatpush.msrb.mxu3 %v576_v18  ;;  %v678_v18 = vld [vmem:[#allocation6 + $0x58] sm:$0xff] }
  0xe4   :  { %691 = vmatpush.msrb.mxu1 %v678_v18 }
  0xe5   :  { %592 = vmatpush.msrb.mxu3 %v575_v19  ;;  %v677_v19 = vld [vmem:[#allocation6 + $0x50] sm:$0xff] }
  0xe6   :  { %692 = vmatpush.msrb.mxu1 %v677_v19 }
  0xe7   :  { %v276_v26 = vpop.f32.mrf.mxu0  ;;  %593 = vmatpush.msrb.mxu3 %v574_v22  ;;  %v676_v22 = vld [vmem:[#allocation6 + $0x48] sm:$0xff] }
  0xe8   :  { %v320_v28 = vsub.f32 %v276_v26, %v304_v24  ;;  %v573_v24 = vld [vmem:[#allocation3 + $0x38] sm:$0xff]  ;;  %693 = vmatpush.msrb.mxu1 %v676_v22 }
  0xe9   :  { %594 = vmatpush.msrb.mxu3 %v573_v24  ;;  %v675_v24 = vld [vmem:[#allocation6 + $0x40] sm:$0xff] }
  0xea   :  { %858 = vmatmul.msk.f32.gmra.mxu1 %vm331_vm5, %v320_v28 }
  0xeb   :  { %595 = vmatpush.msrb.mxu3 %v572_v25  ;;  %694 = vmatpush.msrb.mxu1 %v675_v24  ;;  %v674_v25 = vld [vmem:[#allocation6 + $0x38] sm:$0xff] }
  0xed   :  { %596 = vmatpush.msrb.mxu3 %v571_v27  ;;  %695 = vmatpush.msrb.mxu1 %v674_v25  ;;  %v672_v27 = vld [vmem:[#allocation6 + $0x28] sm:$0xff] }
  0xef   :  { %597 = vmatpush.msrb.mxu3 %v570_v30  ;;  %v671_v30 = vld [vmem:[#allocation6 + $0x20] sm:$0xff] }
  0xf1   :  { %598 = vmatpush.msrb.mxu3 %v569_v32  ;;  %v670_v32 = vld [vmem:[#allocation6 + $0x18] sm:$0xff] }
  0xf2   :  { %859 = vmatmul.msk.f32.gmra.mxu1 %vm331_vm5, %v321_v36 }
  0xf3   :  { %599 = vmatpush.msrb.mxu3 %v568_v34 }
  0xf5   :  { %600 = vmatpush.msrb.mxu3 %v567_v37 }
  0xf7   :  { %601 = vmatpush.msrb.mxu3 %v566_v38  ;;  %v667_v38 = vld [vmem:[#allocation6] sm:$0xff] }
  0xfa   :  { %860 = vmatmul.msk.f32.gmra.mxu1 %vm331_vm5, %v322_v40 }
 0x117   :  { %v401_v44 = vpop.f32.mrf.mxu0 }
 0x118   :  { %v402_v45 = vadd.f32 %v1259_v43, %v401_v44 }
 0x11a   :  { %v449_v46 = vmax.f32 %v402_v45, 0.0  ;;  %v1280_v45 = vld [vmem:[%s1318_s5] ss:$0 sm:$0xff] }
 0x11c   :  { %501 = vmatmul.f32.vlgmr.msrb.gmra.mxu2 %v449_v46 }
 0x11f   :  { %v404_v47 = vpop.f32.mrf.mxu0 }
 0x120   :  { %v405_v48 = vadd.f32 %v1259_v43, %v404_v47 }
 0x122   :  { %v450_v49 = vmax.f32 %v405_v48, 0.0 }
 0x124   :  { %504 = vmatmul.f32.gmra.mxu2 %v450_v49 }
 0x127   :  { %v407_v50 = vpop.f32.mrf.mxu0 }
 0x128   :  { %v408_v51 = vadd.f32 %v1259_v43, %v407_v50 }
 0x12a   :  { %v451_v52 = vmax.f32 %v408_v51, 0.0 }
 0x12c   :  { %507 = vmatmul.f32.gmra.mxu2 %v451_v52 }
 0x12f   :  { %v410_v53 = vpop.f32.mrf.mxu0 }
 0x130   :  { %v411_v54 = vadd.f32 %v1259_v43, %v410_v53 }
 0x132   :  { %v452_v55 = vmax.f32 %v411_v54, 0.0 }
 0x134   :  { %510 = vmatmul.f32.gmra.mxu2 %v452_v55 }
 0x137   :  { %v413_v56 = vpop.f32.mrf.mxu0 }
 0x138   :  { %v414_v57 = vadd.f32 %v1259_v43, %v413_v56 }
 0x13a   :  { %v453_v58 = vmax.f32 %v414_v57, 0.0 }
 0x13c   :  { %513 = vmatmul.f32.gmra.mxu2 %v453_v58  ;;  %v440_v26 = vpop.f32.mrf.mxu3 }
 0x13d   :  { %v441_v33 = vadd.f32 %v1259_v43, %v440_v26  ;;  %v673_v26 = vld [vmem:[#allocation6 + $0x30] sm:$0xff] }
 0x13e   :  { %696 = vmatpush.msrb.mxu1 %v673_v26 }
 0x13f   :  { %v416_v59 = vpop.f32.mrf.mxu0  ;;  %v462_v36 = vmax.f32 %v441_v33, 0.0  ;;  %v669_v33 = vld [vmem:[#allocation6 + $0x10] sm:$0xff] }
 0x140   :  { %v417_v60 = vadd.f32 %v1259_v43, %v416_v59  ;;  %697 = vmatpush.msrb.mxu1 %v672_v27 }
 0x142   :  { %v454_v61 = vmax.f32 %v417_v60, 0.0  ;;  %698 = vmatpush.msrb.mxu1 %v671_v30 }
 0x144   :  { %516 = vmatmul.f32.gmra.mxu2 %v454_v61  ;;  %v443_v35 = vpop.f32.mrf.mxu3  ;;  %699 = vmatpush.msrb.mxu1 %v670_v32 }
 0x145   :  { %v444_v39 = vadd.f32 %v1259_v43, %v443_v35 }
 0x146   :  { %700 = vmatpush.msrb.mxu1 %v669_v33 }
 0x147   :  { %v419_v62 = vpop.f32.mrf.mxu0  ;;  %v463_v40 = vmax.f32 %v444_v39, 0.0 }
 0x148   :  { %v420_v63 = vadd.f32 %v1259_v43, %v419_v62 }
 0x14a   :  { %v455_v0 = vmax.f32 %v420_v63, 0.0 }
 0x14c   :  { %519 = vmatmul.f32.gmra.mxu2 %v455_v0  ;;  %v446_v41 = vpop.f32.mrf.mxu3 }
 0x14d   :  { %v447_v42 = vadd.f32 %v1259_v43, %v446_v41 }
 0x14f   :  { %v422_v1 = vpop.f32.mrf.mxu0  ;;  %v464_v44 = vmax.f32 %v447_v42, 0.0 }
 0x150   :  { %v423_v2 = vadd.f32 %v1259_v43, %v422_v1 }
 0x152   :  { %v456_v3 = vmax.f32 %v423_v2, 0.0 }
 0x154   :  { %522 = vmatmul.f32.gmra.mxu2 %v456_v3 }
 0x157   :  { %v425_v4 = vpop.f32.mrf.mxu0 }
 0x158   :  { %v426_v5 = vadd.f32 %v1259_v43, %v425_v4 }
 0x15a   :  { %v457_v6 = vmax.f32 %v426_v5, 0.0 }
 0x15c   :  { %525 = vmatmul.f32.gmra.mxu2 %v457_v6 }
 0x15f   :  { %v428_v7 = vpop.f32.mrf.mxu1 }
 0x160   :  { %v429_v8 = vadd.f32 %v1259_v43, %v428_v7 }
 0x162   :  { %v458_v9 = vmax.f32 %v429_v8, 0.0 }
 0x164   :  { %528 = vmatmul.f32.gmra.mxu2 %v458_v9 }
 0x167   :  { %v431_v13 = vpop.f32.mrf.mxu1 }
 0x168   :  { %v432_v14 = vadd.f32 %v1259_v43, %v431_v13 }
 0x16a   :  { %v459_v16 = vmax.f32 %v432_v14, 0.0 }
 0x16c   :  { %531 = vmatmul.f32.gmra.mxu2 %v459_v16 }
 0x16f   :  { %v434_v20 = vpop.f32.mrf.mxu1 }
 0x170   :  { %v435_v21 = vadd.f32 %v1259_v43, %v434_v20 }
 0x172   :  { %v460_v23 = vmax.f32 %v435_v21, 0.0 }
 0x174   :  { %534 = vmatmul.f32.gmra.mxu2 %v460_v23 }
 0x177   :  { %v437_v28 = vpop.f32.mrf.mxu1 }
 0x178   :  { %v438_v29 = vadd.f32 %v1259_v43, %v437_v28 }
 0x17a   :  { %v461_v31 = vmax.f32 %v438_v29, 0.0 }
 0x17c   :  { %537 = vmatmul.f32.gmra.mxu2 %v461_v31 }
 0x184   :  { %540 = vmatmul.f32.gmra.mxu2 %v462_v36  ;;  %v668_v36 = vld [vmem:[#allocation6 + $0x8] sm:$0xff] }
 0x185   :  { %701 = vmatpush.msrb.mxu1 %v668_v36 }
 0x187   :  { %702 = vmatpush.msrb.mxu1 %v667_v38 }
 0x18c   :  { %543 = vmatmul.f32.gmra.mxu2 %v463_v40 }
 0x194   :  { %546 = vmatmul.f32.gmra.mxu2 %v464_v44 }
 0x19f   :  { %v502_v46 = vpop.f32.mrf.mxu2 }
 0x1a0   :  { %v503_v47 = vadd.f32 %v1280_v45, %v502_v46 }
 0x1a2   :  { %v550_v48 = vmax.f32 %v503_v47, 0.0  ;;  %v878_v47 = vld [vmem:[%s1320_s7] ss:$0 sm:$0xff] }
 0x1a4   :  { %602 = vmatmul.f32.vlgmr.msrb.gmra.mxu3 %v550_v48 }
 0x1a7   :  { %v505_v49 = vpop.f32.mrf.mxu2 }
 0x1a8   :  { %v506_v50 = vadd.f32 %v1280_v45, %v505_v49 }
 0x1aa   :  { %v551_v51 = vmax.f32 %v506_v50, 0.0 }
 0x1ac   :  { %605 = vmatmul.f32.gmra.mxu3 %v551_v51 }
 0x1af   :  { %v508_v52 = vpop.f32.mrf.mxu2 }
 0x1b0   :  { %v509_v43 = vadd.f32 %v1280_v45, %v508_v52 }
 0x1b2   :  { %v552_v53 = vmax.f32 %v509_v43, 0.0 }
 0x1b4   :  { %608 = vmatmul.f32.gmra.mxu3 %v552_v53 }
 0x1b7   :  { %v511_v54 = vpop.f32.mrf.mxu2 }
 0x1b8   :  { %v512_v55 = vadd.f32 %v1280_v45, %v511_v54 }
 0x1ba   :  { %v553_v56 = vmax.f32 %v512_v55, 0.0 }
 0x1bc   :  { %611 = vmatmul.f32.gmra.mxu3 %v553_v56 }
 0x1bf   :  { %v514_v57 = vpop.f32.mrf.mxu2 }
 0x1c0   :  { %v515_v58 = vadd.f32 %v1280_v45, %v514_v57 }
 0x1c2   :  { %v554_v59 = vmax.f32 %v515_v58, 0.0 }
 0x1c4   :  { %614 = vmatmul.f32.gmra.mxu3 %v554_v59 }
 0x1c7   :  { %v517_v60 = vpop.f32.mrf.mxu2 }
 0x1c8   :  { %v518_v61 = vadd.f32 %v1280_v45, %v517_v60 }
 0x1ca   :  { %v555_v62 = vmax.f32 %v518_v61, 0.0 }
 0x1cc   :  { %617 = vmatmul.f32.gmra.mxu3 %v555_v62 }
 0x1cf   :  { %v520_v63 = vpop.f32.mrf.mxu2 }
 0x1d0   :  { %v521_v0 = vadd.f32 %v1280_v45, %v520_v63 }
 0x1d2   :  { %v556_v1 = vmax.f32 %v521_v0, 0.0 }
 0x1d4   :  { %620 = vmatmul.f32.gmra.mxu3 %v556_v1 }
 0x1d7   :  { %v523_v2 = vpop.f32.mrf.mxu2 }
 0x1d8   :  { %v524_v3 = vadd.f32 %v1280_v45, %v523_v2 }
 0x1da   :  { %v557_v4 = vmax.f32 %v524_v3, 0.0 }
 0x1dc   :  { %623 = vmatmul.f32.gmra.mxu3 %v557_v4 }
 0x1df   :  { %v526_v5 = vpop.f32.mrf.mxu2 }
 0x1e0   :  { %v527_v6 = vadd.f32 %v1280_v45, %v526_v5 }
 0x1e2   :  { %v558_v7 = vmax.f32 %v527_v6, 0.0 }
 0x1e4   :  { %626 = vmatmul.f32.gmra.mxu3 %v558_v7 }
 0x1e7   :  { %v529_v8 = vpop.f32.mrf.mxu2 }
 0x1e8   :  { %v530_v9 = vadd.f32 %v1280_v45, %v529_v8 }
 0x1ea   :  { %v559_v10 = vmax.f32 %v530_v9, 0.0 }
 0x1ec   :  { %629 = vmatmul.f32.gmra.mxu3 %v559_v10 }
 0x1ef   :  { %v532_v13 = vpop.f32.mrf.mxu2 }
 0x1f0   :  { %v533_v14 = vadd.f32 %v1280_v45, %v532_v13 }
 0x1f2   :  { %v560_v16 = vmax.f32 %v533_v14, 0.0 }
 0x1f4   :  { %632 = vmatmul.f32.gmra.mxu3 %v560_v16 }
 0x1f7   :  { %v535_v20 = vpop.f32.mrf.mxu2 }
 0x1f8   :  { %v536_v21 = vadd.f32 %v1280_v45, %v535_v20 }
 0x1fa   :  { %v561_v23 = vmax.f32 %v536_v21, 0.0 }
 0x1fc   :  { %635 = vmatmul.f32.gmra.mxu3 %v561_v23 }
 0x1ff   :  { %v538_v28 = vpop.f32.mrf.mxu2 }
 0x200   :  { %v539_v29 = vadd.f32 %v1280_v45, %v538_v28 }
 0x202   :  { %v562_v31 = vmax.f32 %v539_v29, 0.0 }
 0x204   :  { %638 = vmatmul.f32.gmra.mxu3 %v562_v31 }
 0x207   :  { %v541_v34 = vpop.f32.mrf.mxu2 }
 0x208   :  { %v542_v35 = vadd.f32 %v1280_v45, %v541_v34 }
 0x20a   :  { %v563_v37 = vmax.f32 %v542_v35, 0.0 }
 0x20c   :  { %641 = vmatmul.f32.gmra.mxu3 %v563_v37 }
 0x20f   :  { %v544_v39 = vpop.f32.mrf.mxu2 }
 0x210   :  { %v545_v40 = vadd.f32 %v1280_v45, %v544_v39 }
 0x212   :  { %v564_v41 = vmax.f32 %v545_v40, 0.0 }
 0x214   :  { %644 = vmatmul.f32.gmra.mxu3 %v564_v41 }
 0x217   :  { %v547_v42 = vpop.f32.mrf.mxu2 }
 0x218   :  { %v548_v44 = vadd.f32 %v1280_v45, %v547_v42 }
 0x21a   :  { %v565_v46 = vmax.f32 %v548_v44, 0.0 }
 0x21c   :  { %647 = vmatmul.f32.gmra.mxu3 %v565_v46 }
 0x227   :  { %v603_v48 = vpop.f32.mrf.mxu3 }
 0x228   :  { %v604_v49 = vadd.f32 %v878_v47, %v603_v48 }
 0x22a   :  { %v651_v50 = vmax.f32 %v604_v49, 0.0 }
 0x22c   :  { %703 = vmatmul.f32.vlgmr.msrb.gmra.mxu1 %v651_v50 }
 0x22f   :  { %v606_v51 = vpop.f32.mrf.mxu3 }
 0x230   :  { %v607_v52 = vadd.f32 %v878_v47, %v606_v51 }
 0x232   :  { %v652_v43 = vmax.f32 %v607_v52, 0.0 }
 0x234   :  { %706 = vmatmul.f32.gmra.mxu1 %v652_v43 }
 0x237   :  { %v609_v53 = vpop.f32.mrf.mxu3 }
 0x238   :  { %v610_v54 = vadd.f32 %v878_v47, %v609_v53 }
 0x23a   :  { %v653_v55 = vmax.f32 %v610_v54, 0.0 }
 0x23c   :  { %709 = vmatmul.f32.gmra.mxu1 %v653_v55 }
 0x23f   :  { %v612_v56 = vpop.f32.mrf.mxu3 }
 0x240   :  { %v613_v45 = vadd.f32 %v878_v47, %v612_v56 }
 0x242   :  { %v654_v57 = vmax.f32 %v613_v45, 0.0 }
 0x244   :  { %712 = vmatmul.f32.gmra.mxu1 %v654_v57 }
 0x247   :  { %v615_v58 = vpop.f32.mrf.mxu3 }
 0x248   :  { %v616_v59 = vadd.f32 %v878_v47, %v615_v58 }
 0x24a   :  { %v655_v60 = vmax.f32 %v616_v59, 0.0 }
 0x24c   :  { %715 = vmatmul.f32.gmra.mxu1 %v655_v60 }
 0x24f   :  { %v618_v61 = vpop.f32.mrf.mxu3 }
 0x250   :  { %v619_v62 = vadd.f32 %v878_v47, %v618_v61 }
 0x252   :  { %v656_v63 = vmax.f32 %v619_v62, 0.0 }
 0x254   :  { %718 = vmatmul.f32.gmra.mxu1 %v656_v63 }
 0x257   :  { %v621_v0 = vpop.f32.mrf.mxu3 }
 0x258   :  { %v622_v1 = vadd.f32 %v878_v47, %v621_v0 }
 0x25a   :  { %v657_v2 = vmax.f32 %v622_v1, 0.0 }
 0x25c   :  { %721 = vmatmul.f32.gmra.mxu1 %v657_v2  ;;  %v769_v2 = vld [vmem:[#allocation2] sm:$0x1] }
 0x25f   :  { %v624_v3 = vpop.f32.mrf.mxu3 }
 0x260   :  { %v625_v4 = vadd.f32 %v878_v47, %v624_v3  ;;  %v963_v3 = vmov 0  }
 0x261   :  { %875 = vset.pattern.permute.xlu0 %v963_v3 }
 0x262   :  { %v658_v5 = vmax.f32 %v625_v4, 0.0  ;;  %772 = vperm.xlu0 %875, %v769_v2  }
 0x264   :  { %724 = vmatmul.f32.gmra.mxu1 %v658_v5 }
 0x267   :  { %v627_v6 = vpop.f32.mrf.mxu3 }
 0x268   :  { %v628_v7 = vadd.f32 %v878_v47, %v627_v6 }
 0x26a   :  { %v659_v8 = vmax.f32 %v628_v7, 0.0 }
 0x26c   :  { %727 = vmatmul.f32.gmra.mxu1 %v659_v8 }
 0x26f   :  { %v630_v9 = vpop.f32.mrf.mxu3 }
 0x270   :  { %v631_v10 = vadd.f32 %v878_v47, %v630_v9 }
 0x272   :  { %v660_v11 = vmax.f32 %v631_v10, 0.0 }
 0x274   :  { %730 = vmatmul.f32.gmra.mxu1 %v660_v11 }
 0x277   :  { %v633_v12 = vpop.f32.mrf.mxu3 }
 0x278   :  { %v634_v13 = vadd.f32 %v878_v47, %v633_v12 }
 0x27a   :  { %v661_v14 = vmax.f32 %v634_v13, 0.0 }
 0x27c   :  { %733 = vmatmul.f32.gmra.mxu1 %v661_v14 }
 0x27f   :  { %v636_v15 = vpop.f32.mrf.mxu3 }
 0x280   :  { %v637_v16 = vadd.f32 %v878_v47, %v636_v15 }
 0x282   :  { %v662_v17 = vmax.f32 %v637_v16, 0.0 }
 0x284   :  { %736 = vmatmul.f32.gmra.mxu1 %v662_v17  ;;  %v768_v17 = vld [vmem:[%s1323_s10] sm:$0x1] }
 0x287   :  { %v639_v18 = vpop.f32.mrf.mxu3 }
 0x288   :  { %v640_v19 = vadd.f32 %v878_v47, %v639_v18 }
 0x28a   :  { %v663_v20 = vmax.f32 %v640_v19, 0.0 }
 0x28c   :  { %739 = vmatmul.f32.gmra.mxu1 %v663_v20 }
 0x28f   :  { %v642_v21 = vpop.f32.mrf.mxu3 }
 0x290   :  { %v643_v22 = vadd.f32 %v878_v47, %v642_v21 }
 0x292   :  { %v664_v23 = vmax.f32 %v643_v22, 0.0 }
 0x294   :  { %742 = vmatmul.f32.gmra.mxu1 %v664_v23 }
 0x297   :  { %v645_v24 = vpop.f32.mrf.mxu3 }
 0x298   :  { %v646_v25 = vadd.f32 %v878_v47, %v645_v24 }
 0x29a   :  { %v665_v26 = vmax.f32 %v646_v25, 0.0 }
 0x29c   :  { %745 = vmatmul.f32.gmra.mxu1 %v665_v26 }
 0x29f   :  { %v648_v27 = vpop.f32.mrf.mxu3 }
 0x2a0   :  { %v649_v28 = vadd.f32 %v878_v47, %v648_v27  ;;  %v879_v47 = vld [vmem:[%s1322_s9] ss:$0 sm:$0xff] }
 0x2a2   :  { %v666_v29 = vmax.f32 %v649_v28, 0.0 }
 0x2a4   :  { %748 = vmatmul.f32.gmra.mxu1 %v666_v29 }
 0x2a9   :  { %v1301_v30 = vpop.f32.mrf.mxu1 }
 0x2aa   :  { %v705_v14 = vadd.f32 %v879_v47, %v1301_v30 }
 0x2ac   :  { %v752_v16 = vmax.f32 %v705_v14, 0.0 }
 0x2b1   :  { %v707_v31 = vpop.f32.mrf.mxu1 }
 0x2b2   :  { %v708_v12 = vadd.f32 %v879_v47, %v707_v31 }
 0x2b4   :  { %v753_v15 = vmax.f32 %v708_v12, 0.0 }
 0x2b9   :  { %v710_v32 = vpop.f32.mrf.mxu1 }
 0x2ba   :  { %v711_v10 = vadd.f32 %v879_v47, %v710_v32 }
 0x2bc   :  { %v754_v13 = vmax.f32 %v711_v10, 0.0 }
 0x2c1   :  { %v713_v33 = vpop.f32.mrf.mxu1 }
 0x2c2   :  { %v714_v8 = vadd.f32 %v879_v47, %v713_v33 }
 0x2c4   :  { %v755_v11 = vmax.f32 %v714_v8, 0.0 }
 0x2c9   :  { %v716_v34 = vpop.f32.mrf.mxu1 }
 0x2ca   :  { %v717_v6 = vadd.f32 %v879_v47, %v716_v34 }
 0x2cc   :  { %v756_v9 = vmax.f32 %v717_v6, 0.0 }
 0x2d1   :  { %v719_v35 = vpop.f32.mrf.mxu1 }
 0x2d2   :  { %v720_v4 = vadd.f32 %v879_v47, %v719_v35 }
 0x2d4   :  { %v757_v7 = vmax.f32 %v720_v4, 0.0  ;;  %v773_v18 = vpop.permute.xlu0 %772 }
 0x2d5   :  { %v775_v19 = vperm.slane %v773_v18, 0 }
 0x2d9   :  { %v722_v36 = vpop.f32.mrf.mxu1 }
 0x2da   :  { %v723_v0 = vadd.f32 %v879_v47, %v722_v36 }
 0x2dc   :  { %v758_v5 = vmax.f32 %v723_v0, 0.0 }
 0x2e1   :  { %v725_v37 = vpop.f32.mrf.mxu1 }
 0x2e2   :  { %v726_v62 = vadd.f32 %v879_v47, %v725_v37 }
 0x2e4   :  { %v759_v1 = vmax.f32 %v726_v62, 0.0 }
 0x2e9   :  { %v728_v38 = vpop.f32.mrf.mxu1 }
 0x2ea   :  { %v729_v60 = vadd.f32 %v879_v47, %v728_v38 }
 0x2ec   :  { %v760_v63 = vmax.f32 %v729_v60, 0.0 }
 0x2f1   :  { %v731_v39 = vpop.f32.mrf.mxu1 }
 0x2f2   :  { %v732_v58 = vadd.f32 %v879_v47, %v731_v39 }
 0x2f4   :  { %v761_v61 = vmax.f32 %v732_v58, 0.0 }
 0x2f9   :  { %v734_v40 = vpop.f32.mrf.mxu1 }
 0x2fa   :  { %v735_v45 = vadd.f32 %v879_v47, %v734_v40 }
 0x2fc   :  { %v762_v59 = vmax.f32 %v735_v45, 0.0 }
 0x301   :  { %v737_v41 = vpop.f32.mrf.mxu1 }
 0x302   :  { %v738_v55 = vadd.f32 %v879_v47, %v737_v41 }
 0x304   :  { %v763_v57 = vmax.f32 %v738_v55, 0.0 }
 0x309   :  { %v740_v42 = vpop.f32.mrf.mxu1 }
 0x30a   :  { %v741_v53 = vadd.f32 %v879_v47, %v740_v42 }
 0x30c   :  { %v764_v56 = vmax.f32 %v741_v53, 0.0 }
 0x311   :  { %v743_v44 = vpop.f32.mrf.mxu1 }
 0x312   :  { %v744_v52 = vadd.f32 %v879_v47, %v743_v44 }
 0x314   :  { %v765_v54 = vmax.f32 %v744_v52, 0.0 }
 0x319   :  { %v746_v46 = vpop.f32.mrf.mxu1 }
 0x31a   :  { %v747_v50 = vadd.f32 %v879_v47, %v746_v46 }
 0x31c   :  { %v766_v43 = vmax.f32 %v747_v50, 0.0 }
 0x321   :  { %v749_v48 = vpop.f32.mrf.mxu1 }
 0x322   :  { %v750_v49 = vadd.f32 %v879_v47, %v749_v48 }
 0x324   :  { %v767_v51 = vmax.f32 %v750_v49, 0.0 }
 0x326   :  { %776 = vmatpush.xpose.msra.mxu1 %v767_v51 }
 0x32a   :  { %777 = vmatpush.xpose.msra.mxu1 %v766_v43 }
 0x32e   :  { %778 = vmatpush.xpose.msra.mxu1 %v765_v54 }
 0x332   :  { %779 = vmatpush.xpose.msra.mxu1 %v764_v56 }
 0x336   :  { %780 = vmatpush.xpose.msra.mxu1 %v763_v57 }
 0x33a   :  { %781 = vmatpush.xpose.msra.mxu1 %v762_v59 }
 0x33e   :  { %782 = vmatpush.xpose.msra.mxu1 %v761_v61 }
 0x342   :  { %783 = vmatpush.xpose.msra.mxu1 %v760_v63 }
 0x346   :  { %784 = vmatpush.xpose.msra.mxu1 %v759_v1 }
 0x34a   :  { %785 = vmatpush.xpose.msra.mxu1 %v758_v5 }
 0x34e   :  { %786 = vmatpush.xpose.msra.mxu1 %v757_v7 }
 0x352   :  { %787 = vmatpush.xpose.msra.mxu1 %v756_v9 }
 0x356   :  { %788 = vmatpush.xpose.msra.mxu1 %v755_v11 }
 0x35a   :  { %789 = vmatpush.xpose.msra.mxu1 %v754_v13 }
 0x35e   :  { %790 = vmatpush.xpose.msra.mxu1 %v753_v15 }
 0x362   :  { %791 = vmatpush.xpose.msra.mxu1 %v752_v16 }
 0x365   :  { %792 = vmatmul.f32.vlgmr.msra.gmra.mxu1 %v768_v17 }
 0x3e2   :  { %v793_v20 = vpop.f32.mrf.mxu1 }
 0x3e3   :  { %v794_v21 = vadd.f32 %v793_v20, %v775_v19 }
 0x3e5   :  { %796 = vst [vmem:[#allocation8] sm:$0x1] %v794_v21 }
 0x3e6   :  { %807 = dma.vmem_to_hbm [thread:$0]  %s803_s2, 16, %s805_s21, [#allocation5]  }
 0x3e7   :  { %956 = dma.done.wait [#allocation5], 16  }
 0x3e8   :  { %957 = vsyncadd [#allocation5], 4294967280 }
 0x3e9   :  { %812 = vsyncpa [#allocation4], 1 }
 0x3ea   :  { %813 = vsyncpa [#allocation7], 1 }
 0x3eb   :  { %814 = vsyncpa [#allocation5], 1 }

</bundles_post_ra>
